<compile_context>
chip_gen: v7x
topology: tpu7x:2x2x1
jax: 0.10.0
libtpu: 0.0.40
codegen_flags: <defaults>
</compile_context>

<pallas_src>
import jax
import jax.numpy as jnp
from jax.experimental import pallas as pl
from jax.experimental.pallas import tpu as pltpu


def _ranker_kernel(x_ref, w_ref, b_ref, o_ref):
    # x_ref: (TM, D) f32 VMEM, w_ref: (1, D) f32 VMEM,
    # b_ref: (1,) f32 SMEM,    o_ref: (1, TM) f32 VMEM (lane-dense)
    x = x_ref[...]                                  # (TM, D)
    w = w_ref[...]                                  # (1, D) -> broadcast over rows
    # Elementwise multiply on the VPU, lane reduction on the XLU.
    y = jnp.sum(x * w, axis=-1) + b_ref[0]          # (TM,) f32, scalar bias
    o_ref[0, :] = y                                 # sublane->lane relayout + vst


def _round_up(x, m):
    return ((x + m - 1) // m) * m


def _vmem_capacity_bytes():
    """Physical VMEM of the current chip; conservative fallback if unknown."""
    try:
        return int(pltpu.get_tpu_info().vmem_capacity_bytes)
    except Exception:
        return 64 * 1024 * 1024                     # v7x per-TC (smallest gen)


def _choose_tm(batch, feat, vmem_cap, dtype_bytes=4):
    """Batch tile (multiple of 128 for the lane-dense out block) sized so the
    double-buffered x tiles use ~1/3 of this chip's physical VMEM, capped so
    the grid has at least two tiles when the batch allows (v7x megacore)."""
    x_budget = vmem_cap // 3
    max_rows = x_budget // (2 * feat * dtype_bytes)
    tm = min(max(max_rows, 128), 4096)
    # Guarantee >= 2 tiles when B is big enough so both v7x cores get work.
    two_tile = _round_up(pl.cdiv(batch, 2), 128)
    tm = min(tm, max(128, two_tile))
    tm = max(128, (tm // 128) * 128)                # lane-dense out block
    tm = min(tm, _round_up(batch, 128))             # never bigger than needed
    return tm


def ranker_forward(x, weight, bias, *, tm=None):
    """x: (B, D) f32, weight: (1, D, 1, 1) f32, bias: (1,) f32 -> (B,) f32."""
    B, D = x.shape
    x = x.astype(jnp.float32)
    w2d = weight.reshape(1, D).astype(jnp.float32)
    b1d = bias.reshape(1).astype(jnp.float32)

    vmem_cap = _vmem_capacity_bytes()
    if tm is None:
        tm = _choose_tm(B, D, vmem_cap)
    else:
        tm = max(128, _round_up(int(tm), 128))      # keep the out block lane-dense
    num_tiles = pl.cdiv(B, tm)

    # Explicit scoped-VMEM limit matching the actual buffers (x double-buffer,
    # weight, lane-dense out) plus headroom; never rely on per-gen defaults.
    need = (2 * tm * D + 4 * D + 4 * tm) * 4 + (4 << 20)
    vmem_limit = int(min(max(need, 32 << 20), (vmem_cap * 3) // 4))

    out = pl.pallas_call(
        _ranker_kernel,
        out_shape=jax.ShapeDtypeStruct((1, B), jnp.float32),
        grid_spec=pltpu.PrefetchScalarGridSpec(
            num_scalar_prefetch=0,
            grid=(num_tiles,),
            in_specs=[
                # x: tiled over batch, double-buffered; last tile may be ragged
                # (clipped DMA, garbage rows land only in masked-off lanes).
                pl.BlockSpec((tm, D), lambda i: (i, 0)),
                # w: same block every step -> stays resident in VMEM.
                pl.BlockSpec((1, D), lambda i: (0, 0)),
                # bias: whole (1,) array in SMEM, read as a scalar.
                pl.BlockSpec(memory_space=pltpu.MemorySpace.SMEM),
            ],
            # Lane-dense output tile: full-width unmasked stores, tiny buffers.
            out_specs=pl.BlockSpec((1, tm), lambda i: (0, i)),
        ),
        compiler_params=pltpu.CompilerParams(
            dimension_semantics=("parallel",),
            vmem_limit_bytes=vmem_limit,
        ),
        cost_estimate=pl.CostEstimate(
            flops=2 * B * D,
            transcendentals=0,
            bytes_accessed=4 * (B * D + D + B + 1),
        ),
    )(x, w2d, b1d)

    # Matches PyTorch's x.view([-1]) on the (B, 1, 1, 1) conv output.
    return out.reshape(-1)


if __name__ == "__main__":
    # Small shapes consistent with the module (input_dim = D, output_dim = 1).
    # B = 200 with tm = 128 exercises a 2-tile grid with a ragged last tile.
    B, D = 200, 256

    key = jax.random.PRNGKey(0)
    kx, kw = jax.random.split(key, 2)

    x = jax.random.normal(kx, (B, D), dtype=jnp.float32)
    # Conv2d(D, 1, 1) weight shape: (1, D, 1, 1); small-normal init, small bias
    # (mimicking utils.initialize_weights).
    weight = 0.02 * jax.random.normal(kw, (1, D, 1, 1), dtype=jnp.float32)
    bias = jnp.full((1,), 0.1, dtype=jnp.float32)

    # Pure-JAX reference (1x1 conv over 1x1 spatial == linear layer).
    y_ref = (x @ weight.reshape(1, D).T + bias).reshape(-1)

    # Multi-tile path with a ragged last tile (grid = (2,), tm = 128).
    y = jax.block_until_ready(ranker_forward(x, weight, bias, tm=128))
    assert y.shape == (B,)
    assert jnp.allclose(y, y_ref, atol=1e-4, rtol=1e-4)

    # Auto tile-size path (chip-derived tile; single ragged tile here).
    y2 = jax.block_until_ready(ranker_forward(x, weight, bias))
    assert y2.shape == (B,)
    assert jnp.allclose(y2, y_ref, atol=1e-4, rtol=1e-4)

    print("KERNEL_OK")
</pallas_src>

<mosaic_0001>
module attributes {stable_mosaic.version = 11 : i64} {
  func.func @_ranker_kernel(%arg0: i32, %arg1: memref<128x256xf32, #tpu.memory_space<vmem>>, %arg2: memref<1x256xf32, #tpu.memory_space<vmem>>, %arg3: memref<1xf32, #tpu.memory_space<smem>>, %arg4: memref<1x128xf32, #tpu.memory_space<vmem>>) attributes {dimension_semantics = [#tpu.dimension_semantics<parallel>], iteration_bounds = array<i64: 2>, scalar_prefetch = 0 : i64, scratch_operands = 0 : i64, tpu.core_type = #tpu.core_type<tc>, window_params = [{transform_indices = @transform_0, window_bounds = array<i64: 128, 256>}, {pipeline_mode = #tpu.pipeline_mode<synchronous>, transform_indices = @transform_1, window_bounds = array<i64: 1, 256>}, {transform_indices = @transform_2, window_bounds = array<i64: 1>}, {transform_indices = @transform_3, window_bounds = array<i64: 1, 128>}]} {
    %c0 = arith.constant 0 : index
    %c0_0 = arith.constant 0 : index
    %0 = vector.load %arg1[%c0, %c0_0] : memref<128x256xf32, #tpu.memory_space<vmem>>, vector<128x256xf32>
    %c0_1 = arith.constant 0 : index
    %c0_2 = arith.constant 0 : index
    %1 = vector.load %arg2[%c0_1, %c0_2] : memref<1x256xf32, #tpu.memory_space<vmem>>, vector<1x256xf32>
    %2 = vector.broadcast %1 : vector<1x256xf32> to vector<128x256xf32>
    %3 = arith.mulf %0, %2 : vector<128x256xf32>
    %cst = arith.constant dense<0.000000e+00> : vector<128xf32>
    %4 = vector.multi_reduction <add>, %3, %cst [1] : vector<128x256xf32> to vector<128xf32>
    %c0_3 = arith.constant 0 : index
    %5 = memref.load %arg3[%c0_3] : memref<1xf32, #tpu.memory_space<smem>>
    %6 = vector.broadcast %5 : f32 to vector<128xf32>
    %7 = arith.addf %4, %6 : vector<128xf32>
    %c0_4 = arith.constant 0 : index
    %c0_5 = arith.constant 0 : index
    %8 = vector.load %arg4[%c0_4, %c0_5] : memref<1x128xf32, #tpu.memory_space<vmem>>, vector<1x128xf32>
    %9 = vector.shape_cast %8 : vector<1x128xf32> to vector<128xf32>
    %10 = vector.shape_cast %7 : vector<128xf32> to vector<1x128xf32>
    tpu.vector_store %arg4[%c0_4, %c0_5], %10 {strides = array<i32>} : memref<1x128xf32, #tpu.memory_space<vmem>>, vector<1x128xf32>,
    return
  }
  func.func @transform_0(%arg0: i32) -> (i32, i32) {
    %c0_i32 = arith.constant 0 : i32
    %c0_i32_0 = arith.constant 0 : i32
    return %arg0, %c0_i32 : i32, i32
  }
  func.func @transform_1(%arg0: i32) -> (i32, i32) {
    %c0_i32 = arith.constant 0 : i32
    %c0_i32_0 = arith.constant 0 : i32
    %c0_i32_1 = arith.constant 0 : i32
    return %c0_i32, %c0_i32_0 : i32, i32
  }
  func.func @transform_2(%arg0: i32) -> i32 {
    %c0_i32 = arith.constant 0 : i32
    %c0_i32_0 = arith.constant 0 : i32
    return %c0_i32 : i32
  }
  func.func @transform_3(%arg0: i32) -> (i32, i32) {
    %c0_i32 = arith.constant 0 : i32
    %c0_i32_0 = arith.constant 0 : i32
    return %c0_i32, %arg0 : i32, i32
  }
}

</mosaic_0001>

<bundles_post_ra>
// kernel: tpu_custom_call.1
= control target key start
LH: loop header
LB: loop body
LE: loop exit
PB: predicated region body
PF: predicated region fallthrough
CT: control target
= control target key end

     0   :  { %s1072_s0 = inlined_call_operand.hbm [shape: f32[200,256], index: 0, kind: input, shape index: {}]   ;;  %s1073_s1 = inlined_call_operand.vmem [shape: f32[1,256], index: 1, kind: input, shape index: {}]   ;;  %s1074_s2 = inlined_call_operand.<no memory space> [shape: f32[1], index: 2, kind: input, shape index: {}]   ;;  %s1075_s3 = inlined_call_operand.hbm [shape: f32[1,200], index: 3, kind: output, shape index: {}]  }
   0x1   :  { %8 = sst [smem:[#allocation2]] %s1074_s2 }
   0x2   :  { %9 = vsyncpa [#allocation4], 0 }
   0x3   :  { %11 = vsyncpa [#allocation4 + $0x1], 0 }
   0x4   :  { %12 = vsyncpa [#allocation5], 0 }
   0x5   :  { %14 = vsyncpa [#allocation5 + $0x1], 0  ;;  %s738_s14 = smov 0   ;;  %s740_s15 = smov 0  }
   0x6   :  { %s742_s16 = smov 0   ;;  %s744_s17 = smov 0  }
   0x7 LB: > { %s759_s2 = sadd.s32 4294967295, %s709_s17   ;;  %s553_s18 = sadd.s32 4294967294, %s709_s17   ;;  %s709_s17 = sphi %s744_s17, %s1085_s17   ;;  %s705_s16 = sphi %s742_s16, %s1084_s16   ;;  %s701_s15 = sphi %s740_s15, %s1083_s15   ;;  %s697_s14 = sphi %s738_s14, %s1082_s14  }
   0x8   : > { %s763_s19 = sadd.s32 1, %s709_s17   ;;  %s27_s20 = sadd.s32 1, %s705_s16 }
   0x9   : > { %s24_s21 = ssub.s32 %s709_s17, %s763_s19  ;;  %p34_p0 = scmp.ne.s32.totalorder %s705_s16, %s701_s15 }
   0xa   : > { %p25_p1 = scmp.eq.s32.totalorder %s24_s21, 0  ;;  %p35_p2 = scmp.eq.s32.totalorder %s709_s17, 0 }
   0xb   : > { %p40_p3 = scmp.ne.s32.totalorder %s701_s15, %s697_s14  ;;  %p41_p4 = scmp.eq.s32.totalorder %s759_s2, 0 }
   0xc   : > { %s775_s22 = scalar_select %p25_p1, %s705_s16, %s27_s20  }
   0xd   : > { %p36_p5 = por %p35_p2, %p34_p0  ;;  %p777_p6 = por %p41_p4, %p40_p3 }
   0xe   : > { %p106_p7 = scmp.eq.s32.totalorder %s759_s2, 1  ;;  %p112_p8 = scmp.eq.s32.totalorder %s553_s18, 1 }
   0xf   : > { %p1076_p11 = scmp.ge.s32.totalorder %s709_s17, 2 }
  0x10   : > { %p782_p9 = por %p106_p7, %p34_p0  ;;  %p786_p10 = por %p112_p8, %p40_p3 }
  0x11   : > { %134 = sbr.rel (%p1076_p11) target bundleno = 59 (0x3b), region = 24 }
  0x12   : > { %s1079_s25 = scalar_select %p786_p10, 1, 0 }
  0x18   : > { %137 = sbr.rel (!%p36_p5) target bundleno = 59 (0x3b), region = 28  ;;  %s138_s26 = sand.u32 (%p36_p5), 1, %s705_s16  }
  0x19   : > { %s557_s27 = sshll.u32 (%p36_p5), %s709_s17, 4  ;;  %s556_s28 = sshll.u32 (%p36_p5), %s138_s26, 8 }
  0x1a   : > { %s144_s29 = ssub.s32 (%p36_p5), 25, %s557_s27  ;;  %s798_s5 = scalar_lea.sflag (%p36_p5), [#allocation4], %s138_s26 }
  0x1b   : > { %p145_p12 = scmp.lt.s32.totalorder (%p36_p5), %s144_s29, 16  ;;  %s142_s6 = scalar_lea.vmem (%p36_p5), [#allocation3], %s556_s28 }
  0x1f   : > { %s1087_s29 = smov (!%p145_p12, %s144_s29), 16 }
  0x20   : > { %s795_s30 = sshll.u32 %s1087_s29, 8 }
  0x21   : > { %s150_s4 = ssub.s32 4096, %s795_s30 }
  0x22   : > { %151 = vsyncadd %s798_s5, %s150_s4  ;;  %p560_p13 = scmp.ne.s32.totalorder %s795_s30, 0  ;;  %s572_s7 = sshll.u32 %s709_s17, 12 }
  0x23   : > { %s806_s10 = scalar_lea.hbm %s1072_s0, %s572_s7  ;;  %s157_s11 = sshll.u32 %s142_s6, 4  ;;  %s808_s11 = int_to_ptr.vmem [resolvable:$true] %s157_s11 }
  0x24   : > { %s615_s12 = scalar_lea.hbm %s806_s10, %s795_s30  ;;  %s619_s20 = scalar_lea.hbm %s1072_s0, 6400 }
  0x25   : > { %p616_p0 = scmp.ne.s32.totalorder %s806_s10, %s615_s12  ;;  %p620_p3 = scmp.lt.u32.totalorder %s806_s10, %s1072_s0 }
  0x26   : > { %p621_p4 = scmp.lt.u32.totalorder %s619_s20, %s615_s12  ;;  %p623_p7 = scmp.lt.u32.totalorder %s615_s12, %s806_s10 }
  0x27   : > { %p617_p1 = pnand %p616_p0, %p560_p13 }
  0x28   : > { %p622_p5 = por %p621_p4, %p620_p3 }
  0x29   : > { %p618_p2 = pneg %p617_p1 }
  0x2a   : > { %p624_p8 = por %p623_p7, %p622_p5 }
  0x2c   : > { %p625_p12 = pnand %p624_p8, %p618_p2 }
  0x2e   : > { %628 = shalt.err (!%p625_p12)
}
  0x2f   : > { %s629_s27 = scalar_lea.vmem %s808_s11, %s795_s30  ;;  %s711_s28 = smov [#allocation3]  }
  0x30   : > { %p630_p0 = scmp.ne.s32.totalorder %s808_s11, %s629_s27  ;;  %s633_s29 = sshll.u32 %s711_s28, 4  ;;  %s634_s29 = int_to_ptr.vmem [resolvable:$false] %s633_s29 }
  0x31   : > { %s635_s4 = scalar_lea.vmem %s634_s29, 8192  ;;  %p636_p10 = scmp.lt.s32.totalorder %s808_s11, %s634_s29 }
  0x32   : > { %p631_p1 = pnand %p630_p0, %p560_p13  ;;  %p637_p3 = scmp.lt.s32.totalorder %s635_s4, %s629_s27 }
  0x34   : > { %p632_p11 = pneg %p631_p1  ;;  %p638_p4 = por %p637_p3, %p636_p10 }
  0x36   : > { %p639_p5 = pnand %p638_p4, %p632_p11 }
  0x38   : > { %642 = shalt.err (!%p639_p5)
}
  0x39   : > { %s712_s6 = smov 256   ;;  %s713_s7 = smov 16  }
  0x3a   : > { %163 = dma.hbm_to_vmem [thread:$0]  (%p560_p13), %s806_s10, %s795_s30, %s808_s11, %s798_s5, %s712_s6, %s712_s6, %s713_s7  }
  0x3b PF: > { %p565_p2 = scmp.ge.s32.totalorder %s709_s17, 1  ;;  %p165_p7 = scmp.lt.s32.totalorder %s709_s17, 3 }
  0x3d   : > { %p166_p8 = pnand %p565_p2, %p165_p7 }
  0x3e   : > { %s838_s8 = sand.u32 (!%p166_p8), 1, %s701_s15  }
  0x3f   : > { %169 = sbr.rel (%p166_p8) target bundleno = 273 (0x111), region = 32  ;;  %s566_s9 = sshll.u32 (!%p166_p8), %s838_s8, 8 }
  0x40   : > { %s172_s12 = scalar_lea.sflag (!%p166_p8), [#allocation4], %s838_s8  ;;  %s842_s13 = scalar_lea.vmem (!%p166_p8), [#allocation3], %s566_s9 }
  0x46   : > { %688 = dma.done.wait (%p777_p6), %s172_s12, 4096  }
  0x47   : > { %690 = vsyncadd (%p777_p6), %s172_s12, 4294963200  ;;  %v237_v0 = vlaneseq  ;;  %v203_v6 = vld [vmem:[%s842_s13] sm:$0xff]  ;;  %v204_v7 = vld [vmem:[%s842_s13 + $0x8] sm:$0xff]  ;;  %s327_s5 = sld [smem:[#allocation2]]  ;;  %vm372_vm0 = vcmask 130112   ;;  %vm379_vm1 = vcmask 195712  }
  0x48   : > { %v235_v8 = vld [vmem:[%s1073_s1] sm:$0x3]  ;;  %v208_v12 = vld [vmem:[%s842_s13 + $0x28] sm:$0xff]  ;;  %v205_v13 = vld [vmem:[%s842_s13 + $0x10] sm:$0xff]  ;;  %vm386_vm2 = vcmask 261312   ;;  %vm393_vm3 = vcmask 326912  }
  0x49   : > { %v848_v1 = vshrl.u32 %v237_v0, 7  ;;  %v850_v2 = vand.u32 127, %v237_v0  ;;  %v207_v11 = vld [vmem:[%s842_s13 + $0x20] sm:$0xff]  ;;  %v206_v14 = vld [vmem:[%s842_s13 + $0x18] sm:$0xff]  ;;  %v209_v15 = vld [vmem:[%s842_s13 + $0x30] sm:$0xff]  ;;  %vm400_vm4 = vcmask 392512  }
  0x4a   : > { %v210_v16 = vld [vmem:[%s842_s13 + $0x38] sm:$0xff]  ;;  %v211_v21 = vld [vmem:[%s842_s13 + $0x40] sm:$0xff]  ;;  %v212_v22 = vld [vmem:[%s842_s13 + $0x48] sm:$0xff]  ;;  %vm407_vm5 = vcmask 458112   ;;  %vm414_vm6 = vcmask 523712   ;;  %vm421_vm7 = vcmask 589312  }
  0x4b   : > { %v239_v3 = vsub.s32 0, %v848_v1  ;;  %v243_v4 = vsub.s32 1, %v848_v1  ;;  %v365_v5 = vsub.s32 %v850_v2, %v848_v1  ;;  %v213_v27 = vld [vmem:[%s842_s13 + $0x50] sm:$0xff]  ;;  %v214_v28 = vld [vmem:[%s842_s13 + $0x58] sm:$0xff]  ;;  %v215_v37 = vld [vmem:[%s842_s13 + $0x60] sm:$0xff]  ;;  %vm428_vm8 = vcmask 654912  }
  0x4c   : > { %v216_v38 = vld [vmem:[%s842_s13 + $0x68] sm:$0xff]  ;;  %v217_v39 = vld [vmem:[%s842_s13 + $0x70] sm:$0xff]  ;;  %v218_v40 = vld [vmem:[%s842_s13 + $0x78] sm:$0xff]  ;;  %vm435_vm9 = vcmask 720512   ;;  %vm442_vm10 = vcmask 786112   ;;  %vm449_vm11 = vcmask 851712  }
  0x4d   : > { %v861_v9 = vrot.slane %v235_v8, %v239_v3  ;;  %v863_v10 = vrot.slane %v235_v8, %v243_v4  ;;  %v219_v47 = vld [vmem:[%s842_s13 + $0x80] sm:$0xff]  ;;  %v220_v48 = vld [vmem:[%s842_s13 + $0x88] sm:$0xff]  ;;  %v221_v49 = vld [vmem:[%s842_s13 + $0x90] sm:$0xff]  ;;  %vm456_vm12 = vcmask 917312   ;;  %vm463_vm13 = vcmask 982912   ;;  %s567_s10 = sshll.u32 %s759_s2, 4 }
  0x4e   : > { %v222_v50 = vld [vmem:[%s842_s13 + $0x98] sm:$0xff]  ;;  %v223_v57 = vld [vmem:[%s842_s13 + $0xa0] sm:$0xff]  ;;  %v224_v58 = vld [vmem:[%s842_s13 + $0xa8] sm:$0xff]  ;;  %s196_s11 = scalar_lea.vmem [#allocation6], %s838_s8  ;;  %vm470_vm14 = vcmask 1048512   ;;  %s1028_s26 = scalar_lea.hbm %s1075_s3, %s567_s10 }
  0x4f   : > { %v247_v17 = vmul.f32 %v861_v9, %v203_v6  ;;  %v248_v18 = vmul.f32 %v863_v10, %v204_v7  ;;  %v251_v19 = vmul.f32 %v861_v9, %v207_v11  ;;  %v252_v20 = vmul.f32 %v863_v10, %v208_v12  ;;  %v225_v59 = vld [vmem:[%s842_s13 + $0xb0] sm:$0xff]  ;;  %v226_v60 = vld [vmem:[%s842_s13 + $0xb8] sm:$0xff]  ;;  %v227_v6 = vld [vmem:[%s842_s13 + $0xc0] sm:$0xff]  ;;  %s487_s18 = sshll.u32 %s196_s11, 4  ;;  %s475_s2 = scalar_lea.sflag [#allocation5], %s838_s8  ;;  %s1030_s18 = int_to_ptr.vmem [resolvable:$true] %s487_s18 }
  0x50   : > { %v249_v23 = vmul.f32 %v861_v9, %v205_v13  ;;  %v250_v24 = vmul.f32 %v863_v10, %v206_v14  ;;  %v253_v25 = vmul.f32 %v861_v9, %v209_v15  ;;  %v254_v26 = vmul.f32 %v863_v10, %v210_v16  ;;  %v228_v7 = vld [vmem:[%s842_s13 + $0xc8] sm:$0xff]  ;;  %v229_v8 = vld [vmem:[%s842_s13 + $0xd0] sm:$0xff]  ;;  %v230_v11 = vld [vmem:[%s842_s13 + $0xd8] sm:$0xff]  ;;  %s643_s27 = scalar_lea.vmem %s1030_s18, 16  ;;  %s714_s28 = smov [#allocation6]  }
  0x51   : > { %v279_v29 = vadd.f32 %v248_v18, %v247_v17  ;;  %v285_v30 = vadd.f32 %v252_v20, %v251_v19  ;;  %v255_v32 = vmul.f32 %v861_v9, %v211_v21  ;;  %v256_v33 = vmul.f32 %v863_v10, %v212_v22  ;;  %v231_v20 = vld [vmem:[%s842_s13 + $0xe0] sm:$0xff]  ;;  %v232_v21 = vld [vmem:[%s842_s13 + $0xe8] sm:$0xff]  ;;  %p644_p6 = scmp.ne.s32.totalorder %s1030_s18, %s643_s27  ;;  %s647_s29 = sshll.u32 %s714_s28, 4  ;;  %s648_s29 = int_to_ptr.vmem [resolvable:$false] %s647_s29 }
  0x52   : > { %v282_v31 = vadd.f32 %v250_v24, %v249_v23  ;;  %v288_v34 = vadd.f32 %v254_v26, %v253_v25  ;;  %v257_v35 = vmul.f32 %v861_v9, %v213_v27  ;;  %v258_v36 = vmul.f32 %v863_v10, %v214_v28  ;;  %v233_v23 = vld [vmem:[%s842_s13 + $0xf0] sm:$0xff]  ;;  %v234_v24 = vld [vmem:[%s842_s13 + $0xf8] sm:$0xff]  ;;  %s649_s4 = scalar_lea.vmem %s648_s29, 32  ;;  %p650_p13 = scmp.lt.s32.totalorder %s1030_s18, %s648_s29 }
  0x53   : > { %280 = vadd.xlane.f32.xlu0 %v279_v29  ;;  %286 = vadd.xlane.f32.xlu1 %v285_v30  ;;  %v291_v41 = vadd.f32 %v256_v33, %v255_v32  ;;  %v259_v42 = vmul.f32 %v861_v9, %v215_v37  ;;  %v260_v43 = vmul.f32 %v863_v10, %v216_v38  ;;  %v916_v12 = vadd.s32 4294967280, %v850_v2  ;;  %p645_p10 = pnand %p644_p6, %p782_p9  ;;  %p651_p12 = scmp.lt.s32.totalorder %s649_s4, %s643_s27 }
  0x54   : > { %v294_v44 = vadd.f32 %v258_v36, %v257_v35  ;;  %v261_v45 = vmul.f32 %v861_v9, %v217_v39  ;;  %v262_v46 = vmul.f32 %v863_v10, %v218_v40  ;;  %v263_v52 = vmul.f32 %v861_v9, %v219_v47 }
  0x55   : > { %v297_v51 = vadd.f32 %v260_v43, %v259_v42  ;;  %v264_v53 = vmul.f32 %v863_v10, %v220_v48  ;;  %v265_v55 = vmul.f32 %v861_v9, %v221_v49  ;;  %v266_v56 = vmul.f32 %v863_v10, %v222_v50  ;;  %p646_p11 = pneg %p645_p10  ;;  %p652_p0 = por %p651_p12, %p650_p13 }
  0x56   : > { %v300_v54 = vadd.f32 %v262_v46, %v261_v45  ;;  %v267_v61 = vmul.f32 %v861_v9, %v223_v57  ;;  %v268_v62 = vmul.f32 %v863_v10, %v224_v58  ;;  %v269_v63 = vmul.f32 %v861_v9, %v225_v59 }
  0x57   : > { %283 = vadd.xlane.f32.xlu0 %v282_v31  ;;  %289 = vadd.xlane.f32.xlu1 %v288_v34  ;;  %v303_v0 = vadd.f32 %v264_v53, %v263_v52  ;;  %v306_v3 = vadd.f32 %v266_v56, %v265_v55  ;;  %v270_v4 = vmul.f32 %v863_v10, %v226_v60  ;;  %v367_v22 = vadd.s32 4294967288, %v850_v2  ;;  %p653_p1 = pnand %p652_p0, %p646_p11 }
  0x58   : > { %v309_v13 = vadd.f32 %v268_v62, %v267_v61  ;;  %v271_v14 = vmul.f32 %v861_v9, %v227_v6  ;;  %v272_v15 = vmul.f32 %v863_v10, %v228_v7  ;;  %v377_v16 = vsub.s32 %v916_v12, %v848_v1 }
  0x59   : > { %v312_v17 = vadd.f32 %v270_v4, %v269_v63  ;;  %v273_v18 = vmul.f32 %v861_v9, %v229_v8  ;;  %v274_v19 = vmul.f32 %v863_v10, %v230_v11  ;;  %v381_v25 = vadd.s32 4294967272, %v850_v2 }
  0x5a   : > { %v370_v26 = vsub.s32 %v367_v22, %v848_v1  ;;  %v315_v27 = vadd.f32 %v272_v15, %v271_v14  ;;  %v275_v28 = vmul.f32 %v861_v9, %v231_v20  ;;  %v276_v29 = vmul.f32 %v863_v10, %v232_v21 }
  0x5b   : > { %292 = vadd.xlane.f32.xlu0 %v291_v41  ;;  %295 = vadd.xlane.f32.xlu1 %v294_v44  ;;  %v384_v30 = vsub.s32 %v381_v25, %v848_v1  ;;  %v318_v31 = vadd.f32 %v274_v19, %v273_v18  ;;  %v277_v32 = vmul.f32 %v861_v9, %v233_v23  ;;  %v388_v34 = vadd.s32 4294967264, %v850_v2 }
  0x5c   : > { %v278_v33 = vmul.f32 %v863_v10, %v234_v24  ;;  %v395_v35 = vadd.s32 4294967256, %v850_v2  ;;  %v321_v38 = vadd.f32 %v276_v29, %v275_v28  ;;  %v402_v40 = vadd.s32 4294967248, %v850_v2 }
  0x5d   : > { %v391_v36 = vsub.s32 %v388_v34, %v848_v1  ;;  %v409_v41 = vadd.s32 4294967240, %v850_v2  ;;  %v416_v42 = vadd.s32 4294967232, %v850_v2  ;;  %v946_v43 = vadd.s32 4294967224, %v850_v2 }
  0x5e   : > { %v398_v37 = vsub.s32 %v395_v35, %v848_v1  ;;  %v324_v39 = vadd.f32 %v278_v33, %v277_v32  ;;  %v405_v9 = vsub.s32 %v402_v40, %v848_v1  ;;  %v952_v46 = vadd.s32 4294967216, %v850_v2 }
  0x5f   : > { %298 = vadd.xlane.f32.xlu0 %v297_v51  ;;  %301 = vadd.xlane.f32.xlu1 %v300_v54  ;;  %v412_v10 = vsub.s32 %v409_v41, %v848_v1  ;;  %v419_v44 = vsub.s32 %v416_v42, %v848_v1  ;;  %v426_v45 = vsub.s32 %v946_v43, %v848_v1  ;;  %v955_v47 = vadd.s32 4294967208, %v850_v2 }
  0x60   : > { %v433_v48 = vsub.s32 %v952_v46, %v848_v1  ;;  %v962_v50 = vadd.s32 4294967200, %v850_v2  ;;  %v965_v51 = vadd.s32 4294967192, %v850_v2  ;;  %v972_v54 = vadd.s32 4294967184, %v850_v2 }
  0x61   : > { %v440_v49 = vsub.s32 %v955_v47, %v848_v1  ;;  %v975_v55 = vadd.s32 4294967176, %v850_v2  ;;  %v981_v58 = vstv %s327_s5 }
  0x62   : > { %v447_v52 = vsub.s32 %v962_v50, %v848_v1  ;;  %v454_v53 = vsub.s32 %v965_v51, %v848_v1  ;;  %v461_v56 = vsub.s32 %v972_v54, %v848_v1 }
  0x63   : > { %304 = vadd.xlane.f32.xlu0 %v303_v0  ;;  %307 = vadd.xlane.f32.xlu1 %v306_v3  ;;  %v468_v57 = vsub.s32 %v975_v55, %v848_v1 }
  0x67   : > { %310 = vadd.xlane.f32.xlu0 %v309_v13  ;;  %313 = vadd.xlane.f32.xlu1 %v312_v17 }
  0x6b   : > { %316 = vadd.xlane.f32.xlu0 %v315_v27  ;;  %319 = vadd.xlane.f32.xlu1 %v318_v31 }
  0x6f   : > { %322 = vadd.xlane.f32.xlu0 %v321_v38  ;;  %325 = vadd.xlane.f32.xlu1 %v324_v39 }
  0xe0   : > { %v281_v59 = vpop.xlane.xlu0 %280  ;;  %v287_v60 = vpop.xlane.xlu1 %286 }
  0xe1   : > { %v329_v61 = vadd.f32 %v981_v58, %v281_v59  ;;  %v331_v62 = vadd.f32 %v981_v58, %v287_v60 }
  0xe3   : > { %v366_v6 = vrot.slane %v329_v61, %v365_v5  ;;  %v378_v11 = vrot.slane %v331_v62, %v377_v16 }
  0xe4   : > { %v284_v63 = vpop.xlane.xlu0 %283  ;;  %v290_v0 = vpop.xlane.xlu1 %289 }
  0xe5   : > { %v330_v3 = vadd.f32 %v981_v58, %v284_v63  ;;  %v332_v4 = vadd.f32 %v981_v58, %v290_v0 }
  0xe7   : > { %v371_v7 = vrot.slane %v330_v3, %v370_v26  ;;  %v385_v8 = vrot.slane %v332_v4, %v384_v30 }
  0xe8   : > { %v293_v13 = vpop.xlane.xlu0 %292  ;;  %v296_v14 = vpop.xlane.xlu1 %295 }
  0xe9   : > { %v373_v15 = vsel %vm372_vm0, %v371_v7, %v366_v6  ;;  %v333_v17 = vadd.f32 %v981_v58, %v293_v13  ;;  %v334_v18 = vadd.f32 %v981_v58, %v296_v14 }
  0xea   : > { %v380_v19 = vsel %vm379_vm1, %v378_v11, %v373_v15 }
  0xeb   : > { %v387_v20 = vsel %vm386_vm2, %v385_v8, %v380_v19  ;;  %v392_v2 = vrot.slane %v333_v17, %v391_v36  ;;  %v399_v5 = vrot.slane %v334_v18, %v398_v37 }
  0xec   : > { %v299_v21 = vpop.xlane.xlu0 %298  ;;  %v302_v22 = vpop.xlane.xlu1 %301 }
  0xed   : > { %v394_v23 = vsel %vm393_vm3, %v392_v2, %v387_v20  ;;  %v335_v12 = vadd.f32 %v981_v58, %v299_v21  ;;  %v336_v16 = vadd.f32 %v981_v58, %v302_v22 }
  0xee   : > { %v401_v24 = vsel %vm400_vm4, %v399_v5, %v394_v23 }
  0xef   : > { %v406_v25 = vrot.slane %v335_v12, %v405_v9  ;;  %v413_v26 = vrot.slane %v336_v16, %v412_v10 }
  0xf0   : > { %v305_v27 = vpop.xlane.xlu0 %304  ;;  %v308_v28 = vpop.xlane.xlu1 %307 }
  0xf1   : > { %v408_v29 = vsel %vm407_vm5, %v406_v25, %v401_v24  ;;  %v337_v30 = vadd.f32 %v981_v58, %v305_v27  ;;  %v338_v31 = vadd.f32 %v981_v58, %v308_v28 }
  0xf2   : > { %v415_v32 = vsel %vm414_vm6, %v413_v26, %v408_v29 }
  0xf3   : > { %v420_v33 = vrot.slane %v337_v30, %v419_v44  ;;  %v427_v34 = vrot.slane %v338_v31, %v426_v45 }
  0xf4   : > { %v311_v35 = vpop.xlane.xlu0 %310  ;;  %v314_v36 = vpop.xlane.xlu1 %313 }
  0xf5   : > { %v422_v37 = vsel %vm421_vm7, %v420_v33, %v415_v32  ;;  %v339_v38 = vadd.f32 %v981_v58, %v311_v35  ;;  %v340_v39 = vadd.f32 %v981_v58, %v314_v36 }
  0xf6   : > { %v429_v40 = vsel %vm428_vm8, %v427_v34, %v422_v37 }
  0xf7   : > { %v434_v41 = vrot.slane %v339_v38, %v433_v48  ;;  %v441_v9 = vrot.slane %v340_v39, %v440_v49 }
  0xf8   : > { %v317_v10 = vpop.xlane.xlu0 %316  ;;  %v320_v42 = vpop.xlane.xlu1 %319 }
  0xf9   : > { %v436_v43 = vsel %vm435_vm9, %v434_v41, %v429_v40  ;;  %v341_v44 = vadd.f32 %v981_v58, %v317_v10  ;;  %v342_v45 = vadd.f32 %v981_v58, %v320_v42 }
  0xfa   : > { %v443_v59 = vsel %vm442_vm10, %v441_v9, %v436_v43 }
  0xfb   : > { %v448_v46 = vrot.slane %v341_v44, %v447_v52  ;;  %v455_v47 = vrot.slane %v342_v45, %v454_v53 }
  0xfc   : > { %v323_v48 = vpop.xlane.xlu0 %322  ;;  %v326_v49 = vpop.xlane.xlu1 %325 }
  0xfd   : > { %v450_v60 = vsel %vm449_vm11, %v448_v46, %v443_v59  ;;  %v343_v61 = vadd.f32 %v981_v58, %v323_v48  ;;  %v344_v62 = vadd.f32 %v981_v58, %v326_v49 }
  0xfe   : > { %v457_v63 = vsel %vm456_vm12, %v455_v47, %v450_v60 }
  0xff   : > { %v462_v50 = vrot.slane %v343_v61, %v461_v56  ;;  %v469_v51 = vrot.slane %v344_v62, %v468_v57 }
 0x101   : > { %v464_v52 = vsel %vm463_vm13, %v462_v50, %v457_v63 }
 0x102   : > { %v471_v53 = vsel %vm470_vm14, %v469_v51, %v464_v52 }
 0x103   : > { %473 = vst [vmem:[%s196_s11] sm:$0x1] %v471_v53 }
 0x104   : > { %656 = shalt.err (!%p653_p1)
}
 0x105   : > { %s657_s6 = scalar_lea.hbm %s1028_s26, 16  ;;  %s661_s9 = scalar_lea.hbm %s1075_s3, 32 }
 0x106   : > { %p658_p3 = scmp.ne.s32.totalorder %s1028_s26, %s657_s6  ;;  %p662_p2 = scmp.lt.u32.totalorder %s1028_s26, %s1075_s3 }
 0x107   : > { %p663_p7 = scmp.lt.u32.totalorder %s661_s9, %s657_s6  ;;  %p665_p6 = scmp.lt.u32.totalorder %s657_s6, %s1028_s26 }
 0x108   : > { %p659_p4 = pnand %p658_p3, %p782_p9 }
 0x109   : > { %p664_p8 = por %p663_p7, %p662_p2 }
 0x10a   : > { %p660_p5 = pneg %p659_p4 }
 0x10b   : > { %p666_p10 = por %p665_p6, %p664_p8 }
 0x10d   : > { %p667_p11 = pnand %p666_p10, %p660_p5 }
 0x10f   : > { %670 = shalt.err (!%p667_p11)
}
 0x110   : > { %574 = dma.vmem_to_hbm [thread:$0]  (%p782_p9), %s1030_s18, 16, %s1028_s26, %s475_s2  }
 0x111 PF: > { %s499_s23 = sand.u32 1, %s697_s14   ;;  %p1080_p13 = scmp.ne.s32.totalorder %s1079_s25, 0 }
 0x112   : > { %p1081_p12 = scmp.ge.s32.totalorder %s709_s17, 2  ;;  %s500_s30 = scalar_lea.sflag [#allocation5], %s499_s23 }
 0x114   : > { %p577_p0 = pnand %p1081_p12, %p1080_p13 }
 0x116   : > { %692 = dma.done.wait (!%p577_p0), %s500_s30, 16  }
 0x117   : > { %694 = vsyncadd (!%p577_p0), %s500_s30, 4294967280  ;;  %p17_p1 = scmp.ge.s32.totalorder %s763_s19, 4   ;;  %s1082_s14 = smov %s701_s15 }
 0x118   : > { %s1083_s15 = smov %s705_s16  ;;  %s1084_s16 = smov %s775_s22 }
 0x119   : > { %s1085_s17 = smov %s763_s19  ;;  %19 = sbr.rel (!%p17_p1) target bundleno = 7 (0x7), region = 77 }
 0x120   :  { %504 = vsyncpa [#allocation4], 1 }
 0x121   :  { %506 = vsyncpa [#allocation4 + $0x1], 1 }
 0x122   :  { %507 = vsyncpa [#allocation5], 1 }
 0x123   :  { %509 = vsyncpa [#allocation5 + $0x1], 1 }

</bundles_post_ra>
